<compile_context>
chip_gen: v5e
topology: v5e:2x2
jax: 0.10.0
libtpu: 0.0.40
codegen_flags: <defaults>
</compile_context>

<pallas_src>
import functools

import jax
import jax.numpy as jnp
from jax.experimental import pallas as pl
from jax.experimental.pallas import tpu as pltpu

HIDDE_SIZE_OUT = 8  # matches module-level `hidde_size_out`


def _round_up(x, m):
    return ((x + m - 1) // m) * m


def critic_kernel(conti_ref, discr_ref, w1t_ref, b1t_ref, w23t_ref,
                  embo_ref, bo_ref, o_ref, *, tbc):
    """One batch tile, transposed (batch-on-lanes) layout.

    conti_ref : (2, TB)  float   continuous features, batch on lanes
    discr_ref : (1, TB)  int32   discrete index, batch on lanes
    w1t_ref   : (H, 2)           w1^T
    b1t_ref   : (H, 1)           b1^T
    w23t_ref  : (O, H)           (w2 @ w3)^T        (folded, exact)
    embo_ref  : (O, D)           (emb @ w3)^T       (folded, exact)
    bo_ref    : (O, 1)           (b2 @ w3 + b3)^T   (folded, exact)
    o_ref     : (O, TB) float32  output, batch on lanes (lane-dense store)
    """
    TB = o_ref.shape[1]
    D = embo_ref.shape[1]

    # Resident weights: tiny, loaded once per grid step; hoisted out of the
    # chunk loop (JAX does not CSE broadcasts/slices inside the loop).
    w1t = w1t_ref[...].astype(jnp.float32)
    w1_c0 = w1t[:, 0:1]                         # (H, 1)
    w1_c1 = w1t[:, 1:2]                         # (H, 1)
    b1t = b1t_ref[...].astype(jnp.float32)      # (H, 1)
    w23t = w23t_ref[...].astype(jnp.float32)    # (O, H)
    embo = embo_ref[...].astype(jnp.float32)    # (O, D)
    bo = bo_ref[...].astype(jnp.float32)        # (O, 1)

    conti = conti_ref[...].astype(jnp.float32)  # (2, TB)
    discr = discr_ref[...]                      # (1, TB) int32

    # Process the tile in static lane chunks so intermediates are O(tbc),
    # independent of TB (review item: no full (D, TB) iota / one-hot).
    n_chunks = TB // tbc
    for c in range(n_chunks):                   # static unroll, static slices
        lo, hi = c * tbc, (c + 1) * tbc
        conti_c = conti[:, lo:hi]               # (2, tbc)
        discr_c = discr[:, lo:hi]               # (1, tbc)

        # --- first layer: K=2 contraction as VPU broadcast-FMA + ReLU ---
        h = jnp.maximum(
            w1_c0 * conti_c[0:1, :] + w1_c1 * conti_c[1:2, :] + b1t, 0.0)  # (H, tbc)

        # --- folded continuous output on the MXU: (O, H) @ (H, tbc) ---
        out_c = jnp.dot(w23t, h, preferred_element_type=jnp.float32)        # (O, tbc)

        # --- embedding path: per-chunk one-hot contraction on the MXU ---
        iota = jax.lax.broadcasted_iota(jnp.int32, (D, tbc), 0)
        onehot = (iota == discr_c).astype(jnp.float32)                      # (D, tbc)
        out_d = jnp.dot(embo, onehot, preferred_element_type=jnp.float32)   # (O, tbc)

        # --- lane-dense store of this chunk ---
        o_ref[:, lo:hi] = (out_c + out_d + bo).astype(o_ref.dtype)


def critic_net_forward_t(conti_t, discr, params, *, tb=16384, tbc=1024):
    """Fast path (no wrapper HBM passes).

    conti_t : (2, B) float32/bfloat16 — continuous features, batch on lanes.
    discr   : (B,)   integer          — discrete state index.
    Returns (out_size, B) float32 (batch on lanes); the consumer fuses any
    transpose it needs.
    """
    w1, b1, w2, b2, emb, w3, b3 = params
    _, B = conti_t.shape
    H = w1.shape[1]
    O = w3.shape[1]
    D = emb.shape[0]

    # Fold the post-ReLU linear algebra in the wrapper (exact; tiny matmuls).
    hi_prec = jax.lax.Precision.HIGHEST
    w23 = jnp.dot(w2, w3, precision=hi_prec)          # (H, O)
    emb_out = jnp.dot(emb, w3, precision=hi_prec)     # (D, O)
    b_out = jnp.dot(b2, w3, precision=hi_prec) + b3   # (1, O)

    w1t = w1.T                                        # (H, 2)
    b1t = b1.reshape(1, H).T                          # (H, 1)
    w23t = w23.T                                      # (O, H)
    emb_out_t = emb_out.T                             # (O, D)
    b_out_t = b_out.reshape(1, O).T                   # (O, 1)

    discr2 = discr.astype(jnp.int32).reshape(1, B)    # (1, B)

    # Tile / chunk selection.
    tbc = max(128, _round_up(tbc, 128))
    if B < 128:
        TB = B                                        # full-dim block (tiny batch)
        TBC = TB
    else:
        TB = min(_round_up(max(tb, 128), 128), _round_up(B, 128))
        TBC = min(tbc, TB)
        if TB % TBC:
            TB = _round_up(TB, TBC)                   # ragged tail handled by Pallas
    grid = (pl.cdiv(B, TB),)

    cost = pl.CostEstimate(
        flops=int(B * (4 * H + 2 * H * O + 2 * D * O + 3 * O)),
        transcendentals=0,
        bytes_accessed=int(B * (2 * 4 + 4 + O * 4)
                           + 4 * (3 * H + H * O + D * O + O)),
    )

    out_t = pl.pallas_call(
        functools.partial(critic_kernel, tbc=TBC),
        out_shape=jax.ShapeDtypeStruct((O, B), jnp.float32),
        grid=grid,
        in_specs=[
            pl.BlockSpec((2, TB), lambda i: (0, i)),   # conti_t (batch-tiled)
            pl.BlockSpec((1, TB), lambda i: (0, i)),   # discr   (batch-tiled)
            pl.BlockSpec((H, 2), lambda i: (0, 0)),    # w1^T    (resident)
            pl.BlockSpec((H, 1), lambda i: (0, 0)),    # b1^T    (resident)
            pl.BlockSpec((O, H), lambda i: (0, 0)),    # (w2@w3)^T
            pl.BlockSpec((O, D), lambda i: (0, 0)),    # (emb@w3)^T
            pl.BlockSpec((O, 1), lambda i: (0, 0)),    # (b2@w3+b3)^T
        ],
        out_specs=pl.BlockSpec((O, TB), lambda i: (0, i)),
        compiler_params=pltpu.CompilerParams(
            dimension_semantics=("parallel",)),
        cost_estimate=cost,
    )(conti_t, discr2, w1t, b1t, w23t, emb_out_t, b_out_t)

    return out_t


def critic_net_forward(x, params, *, tb=16384, tbc=1024):
    """Module-equivalent entry point: x (B, 3) float -> (B, out_size) float32.

    NOTE: slicing/transposing x and transposing the output are extra HBM
    passes (per the review); throughput-critical callers should construct the
    split, batch-on-lanes inputs directly and call `critic_net_forward_t`.
    """
    conti_t = x[:, 0:2].T                           # (2, B)
    discr = x[:, 2].astype(jnp.int32)               # (B,)
    out_t = critic_net_forward_t(conti_t, discr, params, tb=tb, tbc=tbc)
    return out_t.T                                  # (B, out_size)


def init_params(key, state_size, out_size, discr_size, hidde_size):
    in_conti = state_size - 1  # = 2
    ks = jax.random.split(key, 7)
    scale = 0.1
    w1 = scale * jax.random.normal(ks[0], (in_conti, hidde_size), jnp.float32)
    b1 = scale * jax.random.normal(ks[1], (1, hidde_size), jnp.float32)
    w2 = scale * jax.random.normal(ks[2], (hidde_size, HIDDE_SIZE_OUT), jnp.float32)
    b2 = scale * jax.random.normal(ks[3], (1, HIDDE_SIZE_OUT), jnp.float32)
    emb = scale * jax.random.normal(ks[4], (discr_size, HIDDE_SIZE_OUT), jnp.float32)
    w3 = scale * jax.random.normal(ks[5], (HIDDE_SIZE_OUT, out_size), jnp.float32)
    b3 = scale * jax.random.normal(ks[6], (1, out_size), jnp.float32)
    return (w1, b1, w2, b2, emb, w3, b3)


def reference_forward(x, params):
    w1, b1, w2, b2, emb, w3, b3 = params
    conti = x[:, 0:2]
    discr = x[:, 2].astype(jnp.int32)
    h = jnp.maximum(conti @ w1 + b1, 0.0)
    hc = h @ w2 + b2
    hd = emb[discr]
    return (hc + hd) @ w3 + b3


if __name__ == "__main__":
    B = 8
    state_size = 3
    out_size = 4
    discr_size = 16
    hidde_size = 32

    key = jax.random.PRNGKey(0)
    k_c, k_d, k_p = jax.random.split(key, 3)

    conti = jax.random.normal(k_c, (B, state_size - 1), jnp.float32)        # (B, 2)
    discr = jax.random.randint(k_d, (B,), 0, discr_size, dtype=jnp.int32)   # (B,)
    params = init_params(k_p, state_size, out_size, discr_size, hidde_size)

    # Module-equivalent packed input (continuous features + discrete index).
    x = jnp.concatenate([conti, discr.astype(jnp.float32)[:, None]], axis=1)  # (B, 3)

    # Fast path: pre-split, batch-on-lanes inputs -> (out_size, B).
    out_t = critic_net_forward_t(conti.T, discr, params)
    out_t = jax.block_until_ready(out_t)

    # Module-semantics wrapper: x -> (B, out_size).
    out = critic_net_forward(x, params)
    out = jax.block_until_ready(out)

    ref = reference_forward(x, params)
    assert out.shape == (B, out_size)
    assert out_t.shape == (out_size, B)
    assert jnp.allclose(out, ref, atol=1e-4, rtol=1e-4), "wrapper mismatch vs reference"
    assert jnp.allclose(out_t.T, ref, atol=1e-4, rtol=1e-4), "fast path mismatch vs reference"

    print("KERNEL_OK")
</pallas_src>

<mosaic_0001>
module attributes {stable_mosaic.version = 11 : i64} {
  func.func @critic_kernel(%arg0: i32, %arg1: memref<2x8xf32, #tpu.memory_space<vmem>>, %arg2: memref<1x8xi32, #tpu.memory_space<vmem>>, %arg3: memref<32x2xf32, #tpu.memory_space<vmem>>, %arg4: memref<32x1xf32, #tpu.memory_space<vmem>>, %arg5: memref<4x32xf32, #tpu.memory_space<vmem>>, %arg6: memref<4x16xf32, #tpu.memory_space<vmem>>, %arg7: memref<4x1xf32, #tpu.memory_space<vmem>>, %arg8: memref<4x8xf32, #tpu.memory_space<vmem>>) attributes {dimension_semantics = [#tpu.dimension_semantics<parallel>], iteration_bounds = array<i64: 1>, scalar_prefetch = 0 : i64, scratch_operands = 0 : i64, tpu.core_type = #tpu.core_type<tc>, window_params = [{transform_indices = @transform_0, window_bounds = array<i64: 2, 8>}, {transform_indices = @transform_1, window_bounds = array<i64: 1, 8>}, {pipeline_mode = #tpu.pipeline_mode<synchronous>, transform_indices = @transform_2, window_bounds = array<i64: 32, 2>}, {pipeline_mode = #tpu.pipeline_mode<synchronous>, transform_indices = @transform_3, window_bounds = array<i64: 32, 1>}, {pipeline_mode = #tpu.pipeline_mode<synchronous>, transform_indices = @transform_4, window_bounds = array<i64: 4, 32>}, {pipeline_mode = #tpu.pipeline_mode<synchronous>, transform_indices = @transform_5, window_bounds = array<i64: 4, 16>}, {pipeline_mode = #tpu.pipeline_mode<synchronous>, transform_indices = @transform_6, window_bounds = array<i64: 4, 1>}, {transform_indices = @transform_7, window_bounds = array<i64: 4, 8>}]} {
    %c0 = arith.constant 0 : index
    %c0_0 = arith.constant 0 : index
    %0 = vector.load %arg3[%c0, %c0_0] : memref<32x2xf32, #tpu.memory_space<vmem>>, vector<32x2xf32>
    %1 = vector.extract_strided_slice %0 {offsets = [0, 0], sizes = [32, 1], strides = [1, 1]} : vector<32x2xf32> to vector<32x1xf32>
    %2 = vector.extract_strided_slice %0 {offsets = [0, 1], sizes = [32, 1], strides = [1, 1]} : vector<32x2xf32> to vector<32x1xf32>
    %c0_1 = arith.constant 0 : index
    %c0_2 = arith.constant 0 : index
    %3 = vector.load %arg4[%c0_1, %c0_2] : memref<32x1xf32, #tpu.memory_space<vmem>>, vector<32x1xf32>
    %c0_3 = arith.constant 0 : index
    %c0_4 = arith.constant 0 : index
    %4 = vector.load %arg5[%c0_3, %c0_4] : memref<4x32xf32, #tpu.memory_space<vmem>>, vector<4x32xf32>
    %c0_5 = arith.constant 0 : index
    %c0_6 = arith.constant 0 : index
    %5 = vector.load %arg6[%c0_5, %c0_6] : memref<4x16xf32, #tpu.memory_space<vmem>>, vector<4x16xf32>
    %c0_7 = arith.constant 0 : index
    %c0_8 = arith.constant 0 : index
    %6 = vector.load %arg7[%c0_7, %c0_8] : memref<4x1xf32, #tpu.memory_space<vmem>>, vector<4x1xf32>
    %c0_9 = arith.constant 0 : index
    %c0_10 = arith.constant 0 : index
    %7 = vector.load %arg1[%c0_9, %c0_10] : memref<2x8xf32, #tpu.memory_space<vmem>>, vector<2x8xf32>
    %c0_11 = arith.constant 0 : index
    %c0_12 = arith.constant 0 : index
    %8 = vector.load %arg2[%c0_11, %c0_12] : memref<1x8xi32, #tpu.memory_space<vmem>>, vector<1x8xi32>
    %9 = vector.extract_strided_slice %7 {offsets = [0, 0], sizes = [1, 8], strides = [1, 1]} : vector<2x8xf32> to vector<1x8xf32>
    %10 = vector.broadcast %1 : vector<32x1xf32> to vector<32x8xf32>
    %11 = vector.broadcast %9 : vector<1x8xf32> to vector<32x8xf32>
    %12 = arith.mulf %10, %11 : vector<32x8xf32>
    %13 = vector.extract_strided_slice %7 {offsets = [1, 0], sizes = [1, 8], strides = [1, 1]} : vector<2x8xf32> to vector<1x8xf32>
    %14 = vector.broadcast %2 : vector<32x1xf32> to vector<32x8xf32>
    %15 = vector.broadcast %13 : vector<1x8xf32> to vector<32x8xf32>
    %16 = arith.mulf %14, %15 : vector<32x8xf32>
    %17 = arith.addf %12, %16 : vector<32x8xf32>
    %18 = vector.broadcast %3 : vector<32x1xf32> to vector<32x8xf32>
    %19 = arith.addf %17, %18 : vector<32x8xf32>
    %cst = arith.constant 0.000000e+00 : f32
    %20 = vector.broadcast %cst : f32 to vector<32x8xf32>
    %21 = arith.maximumf %19, %20 : vector<32x8xf32>
    %cst_13 = arith.constant dense<0.000000e+00> : vector<4x8xf32>
    %22 = tpu.matmul %4, %21, %cst_13 {dimension_numbers = #tpu.dot_dimension_numbers<[1], [0], [0], [1], [0, 0, 1, 1], [], []>} : vector<4x32xf32>, vector<32x8xf32>, vector<4x8xf32> -> vector<4x8xf32>
    %23 = tpu.iota {dimensions = array<i32: 0>} : vector<16x8xi32>
    %24 = vector.broadcast %8 : vector<1x8xi32> to vector<16x8xi32>
    %25 = arith.cmpi eq, %23, %24 : vector<16x8xi32>
    %26 = arith.extui %25 : vector<16x8xi1> to vector<16x8xi32>
    %27 = arith.sitofp %26 : vector<16x8xi32> to vector<16x8xf32>
    %cst_14 = arith.constant dense<0.000000e+00> : vector<4x8xf32>
    %28 = tpu.matmul %5, %27, %cst_14 {dimension_numbers = #tpu.dot_dimension_numbers<[1], [0], [0], [1], [0, 0, 1, 1], [], []>} : vector<4x16xf32>, vector<16x8xf32>, vector<4x8xf32> -> vector<4x8xf32>
    %29 = arith.addf %22, %28 : vector<4x8xf32>
    %30 = vector.broadcast %6 : vector<4x1xf32> to vector<4x8xf32>
    %31 = arith.addf %29, %30 : vector<4x8xf32>
    %c0_15 = arith.constant 0 : index
    %c0_16 = arith.constant 0 : index
    %32 = vector.load %arg8[%c0_15, %c0_16] : memref<4x8xf32, #tpu.memory_space<vmem>>, vector<4x8xf32>
    tpu.vector_store %arg8[%c0_15, %c0_16], %31 {strides = array<i32>} : memref<4x8xf32, #tpu.memory_space<vmem>>, vector<4x8xf32>,
    return
  }
  func.func @transform_0(%arg0: i32) -> (i32, i32) {
    %c0_i32 = arith.constant 0 : i32
    %c0_i32_0 = arith.constant 0 : i32
    return %c0_i32, %arg0 : i32, i32
  }
  func.func @transform_1(%arg0: i32) -> (i32, i32) {
    %c0_i32 = arith.constant 0 : i32
    %c0_i32_0 = arith.constant 0 : i32
    return %c0_i32, %arg0 : i32, i32
  }
  func.func @transform_2(%arg0: i32) -> (i32, i32) {
    %c0_i32 = arith.constant 0 : i32
    %c0_i32_0 = arith.constant 0 : i32
    %c0_i32_1 = arith.constant 0 : i32
    return %c0_i32, %c0_i32_0 : i32, i32
  }
  func.func @transform_3(%arg0: i32) -> (i32, i32) {
    %c0_i32 = arith.constant 0 : i32
    %c0_i32_0 = arith.constant 0 : i32
    %c0_i32_1 = arith.constant 0 : i32
    return %c0_i32, %c0_i32_0 : i32, i32
  }
  func.func @transform_4(%arg0: i32) -> (i32, i32) {
    %c0_i32 = arith.constant 0 : i32
    %c0_i32_0 = arith.constant 0 : i32
    %c0_i32_1 = arith.constant 0 : i32
    return %c0_i32, %c0_i32_0 : i32, i32
  }
  func.func @transform_5(%arg0: i32) -> (i32, i32) {
    %c0_i32 = arith.constant 0 : i32
    %c0_i32_0 = arith.constant 0 : i32
    %c0_i32_1 = arith.constant 0 : i32
    return %c0_i32, %c0_i32_0 : i32, i32
  }
  func.func @transform_6(%arg0: i32) -> (i32, i32) {
    %c0_i32 = arith.constant 0 : i32
    %c0_i32_0 = arith.constant 0 : i32
    %c0_i32_1 = arith.constant 0 : i32
    return %c0_i32, %c0_i32_0 : i32, i32
  }
  func.func @transform_7(%arg0: i32) -> (i32, i32) {
    %c0_i32 = arith.constant 0 : i32
    %c0_i32_0 = arith.constant 0 : i32
    return %c0_i32, %arg0 : i32, i32
  }
}

</mosaic_0001>

<bundles_post_ra>
// kernel: tpu_custom_call.1
= control target key start
LH: loop header
LB: loop body
LE: loop exit
PB: predicated region body
PF: predicated region fallthrough
CT: control target
= control target key end

     0   :  { %v246_v2 = vmov 0   ;;  %s332_s0 = inlined_call_operand.vmem [shape: f32[2,8], index: 0, kind: input, shape index: {}]   ;;  %s333_s1 = inlined_call_operand.vmem [shape: s32[1,8], index: 1, kind: input, shape index: {}]   ;;  %s334_s2 = inlined_call_operand.vmem [shape: f32[32,2], index: 2, kind: input, shape index: {}]   ;;  %s335_s3 = inlined_call_operand.vmem [shape: f32[32,1], index: 3, kind: input, shape index: {}]   ;;  %s336_s4 = inlined_call_operand.vmem [shape: f32[4,32], index: 4, kind: input, shape index: {}]   ;;  %s337_s5 = inlined_call_operand.vmem [shape: f32[4,16], index: 5, kind: input, shape index: {}]   ;;  %s338_s6 = inlined_call_operand.vmem [shape: f32[4,1], index: 6, kind: input, shape index: {}]   ;;  %s339_s7 = inlined_call_operand.hbm [shape: f32[4,8], index: 7, kind: output, shape index: {}]  }
   0x1   :  { %v30_v0 = vld [vmem:[%s334_s2 + $0x18] sm:$0xff]  ;;  %v29_v1 = vld [vmem:[%s334_s2 + $0x10] sm:$0xff]  ;;  %212 = vset.pattern.permute.xlu1 %v246_v2  ;;  %210 = vset.pattern.permute.xlu0 %v246_v2  ;;  %v28_v3 = vld [vmem:[%s334_s2 + $0x8] sm:$0xff] }
   0x2   :  { %57 = vperm.xlu0 %210, %v30_v0   ;;  %52 = vperm.xlu1 %212, %v29_v1  }
   0x3   :  { %214 = vset.pattern.permute.xlu2 %v246_v2 }
   0x4   :  { %12 = vsyncpa [#allocation3], 0  ;;  %47 = vperm.xlu2 %214, %v28_v3   ;;  %v247_v4 = vmov 1   ;;  %v27_v5 = vld [vmem:[%s334_s2] sm:$0xff]  ;;  %v34_v6 = vld [vmem:[%s335_s3 + $0x18] sm:$0xff]  ;;  %v118_v12 = vlaneseq  ;;  %v248_v18 = vmov 1.0  }
   0x5   :  { %v33_v7 = vld [vmem:[%s335_s3 + $0x10] sm:$0xff]  ;;  %v31_v8 = vld [vmem:[%s335_s3] sm:$0xff]  ;;  %v32_v9 = vld [vmem:[%s335_s3 + $0x8] sm:$0xff]  ;;  %vm128_vm2 = vcmask 130048   ;;  %vm152_vm3 = vcmask 261120   ;;  %s191_s25 = sshll.u32 %s339_s7, 4  ;;  %s192_s25 = int_to_ptr.hbm [resolvable:$true] %s191_s25 }
   0x6   :  { %v37_v10 = vld [vmem:[%s338_s6] sm:$0xf]  ;;  %v119_v13 = vshrl.u32 %v118_v12, 7  ;;  %vm182_vm4 = vcmask 60416  }
   0x7   :  { %v219_v15 = vld [vmem:[%s333_s1] ss:$0 sm:$0xff] }
   0x8   :  { %v120_v14 = vadd.s32 8, %v119_v13  ;;  %vm122_vm1 = vcmp.eq.s32.totalorder %v119_v13, %v219_v15  ;;  %v36_v19 = vld [vmem:[%s337_s5] sm:$0xf]  ;;  %s249_s5 = smov [#allocation2]  }
   0x9   :  { %v38_v23 = vld [vmem:[%s332_s0] sm:$0x3]  ;;  %s189_s22 = sshll.u32 %s249_s5, 4  ;;  %s190_s22 = int_to_ptr.vmem [resolvable:$true] %s189_s22 }
   0xa   :  { %211 = vset.pattern.permute.xlu0 %v247_v4  ;;  %213 = vset.pattern.permute.xlu1 %v247_v4  ;;  %vm123_vm0 = vcmp.eq.s32.totalorder %v120_v14, %v219_v15  ;;  %v81_v24 = vperm.slane %v38_v23, 1  ;;  %v60_v25 = vperm.slane %v38_v23, 0  ;;  %v35_v52 = vld [vmem:[%s336_s4] sm:$0xf] }
   0xb   :  { %78 = vperm.xlu0 %211, %v30_v0   ;;  %74 = vperm.xlu1 %213, %v29_v1  }
   0xc   :  { %215 = vset.pattern.permute.xlu2 %v247_v4  ;;  %202 = vmatpush.msk.msra.mxu0 %vm123_vm0, %v248_v18 }
   0xd   :  { %70 = vperm.xlu2 %215, %v28_v3  }
   0xe   :  { %203 = vmatpush.msk.msra.mxu0 %vm122_vm1, %v248_v18 }
   0xf   :  { %204 = vmatmul.msk.f32.vlgmr.msra.gmra.mxu0 %vm128_vm2, %v36_v19 }
  0x13   :  { %216 = vset.pattern.permute.xlu1 %v246_v2  ;;  %66 = vperm.xlu0 %211, %v27_v5  }
  0x14   :  { %107 = vperm.xlu1 %216, %v34_v6  }
  0x15   :  { %217 = vset.pattern.permute.xlu2 %v246_v2 }
  0x16   :  { %42 = vperm.xlu2 %217, %v27_v5  }
  0x1b   :  { %218 = vset.pattern.permute.xlu0 %v246_v2 }
  0x1c   :  { %102 = vperm.xlu1 %216, %v33_v7   ;;  %92 = vperm.xlu0 %218, %v31_v8  }
  0x1e   :  { %97 = vperm.xlu2 %217, %v32_v9  }
  0x24   :  { %178 = vperm.xlu1 %216, %v37_v10  }
  0x5e   :  { %v48_v11 = vpop.permute.xlu2 %47 }
  0x5f   :  { %v62_v32 = vmul.f32 %v60_v25, %v48_v11 }
  0x67   :  { %v71_v20 = vpop.permute.xlu2 %70 }
  0x68   :  { %v83_v33 = vmul.f32 %v81_v24, %v71_v20 }
  0x6a   :  { %v87_v39 = vadd.f32 %v83_v33, %v62_v32 }
  0x70   :  { %v43_v27 = vpop.permute.xlu2 %42 }
  0x71   :  { %v61_v37 = vmul.f32 %v60_v25, %v43_v27 }
  0x74   :  { %v53_v16 = vpop.permute.xlu1 %52  ;;  %v58_v17 = vpop.permute.xlu0 %57 }
  0x75   :  { %v64_v28 = vmul.f32 %v60_v25, %v58_v17  ;;  %v63_v38 = vmul.f32 %v60_v25, %v53_v16 }
  0x78   :  { %v98_v41 = vpop.permute.xlu2 %97 }
  0x79   :  { %v111_v45 = vadd.f32 %v98_v41, %v87_v39 }
  0x7b   :  { %v115_v50 = vmax.f32 %v111_v45, 0.0 }
  0x7d   :  { %v79_v21 = vpop.permute.xlu0 %78  ;;  %v75_v22 = vpop.permute.xlu1 %74 }
  0x7e   :  { %v85_v26 = vmul.f32 %v81_v24, %v79_v21  ;;  %v84_v35 = vmul.f32 %v81_v24, %v75_v22 }
  0x80   :  { %v89_v30 = vadd.f32 %v85_v26, %v64_v28  ;;  %v88_v42 = vadd.f32 %v84_v35, %v63_v38 }
  0x85   :  { %v67_v29 = vpop.permute.xlu0 %66 }
  0x86   :  { %v108_v31 = vpop.permute.xlu1 %107  ;;  %v82_v40 = vmul.f32 %v81_v24, %v67_v29 }
  0x87   :  { %v113_v34 = vadd.f32 %v108_v31, %v89_v30 }
  0x88   :  { %v86_v47 = vadd.f32 %v82_v40, %v61_v37 }
  0x89   :  { %v117_v36 = vmax.f32 %v113_v34, 0.0 }
  0x8b   :  { %168 = vmatpush.msra.mxu1 %v117_v36 }
  0x8c   :  { %v149_v53 = vpop.f32.mrf.mxu0 }
  0x8e   :  { %v103_v43 = vpop.permute.xlu1 %102  ;;  %v93_v44 = vpop.permute.xlu0 %92 }
  0x8f   :  { %v112_v46 = vadd.f32 %v103_v43, %v88_v42  ;;  %v110_v49 = vadd.f32 %v93_v44, %v86_v47 }
  0x91   :  { %v116_v48 = vmax.f32 %v112_v46, 0.0  ;;  %v114_v51 = vmax.f32 %v110_v49, 0.0 }
  0x93   :  { %169 = vmatpush.msra.mxu1 %v116_v48 }
  0x95   :  { %170 = vmatpush.msra.mxu1 %v115_v50 }
  0x96   :  { %v179_v56 = vpop.permute.xlu1 %178 }
  0x97   :  { %171 = vmatpush.msra.mxu1 %v114_v51 }
  0x98   :  { %205 = vmatmul.msk.f32.vlgmr.msra.gmra.mxu1 %vm152_vm3, %v35_v52 }
 0x115   :  { %v173_v54 = vpop.f32.mrf.mxu1 }
 0x116   :  { %v174_v55 = vadd.f32 %v173_v54, %v149_v53 }
 0x118   :  { %v181_v57 = vadd.f32 %v179_v56, %v174_v55 }
 0x11a   :  { %183 = vst.msk [vmem:[#allocation2] sm:$0xf] %vm182_vm4, %v181_v57 }
 0x11b   :  { %194 = dma.vmem_to_hbm [thread:$0]  %s190_s22, 64, %s192_s25, [#allocation3]  }
 0x11c   :  { %244 = dma.done.wait [#allocation3], 64  }
 0x11d   :  { %245 = vsyncadd [#allocation3], 4294967232 }
 0x11e   :  { %199 = vsyncpa [#allocation3], 1 }

</bundles_post_ra>
